<compile_context>
chip_gen: v7x
topology: tpu7x:2x2x1
jax: 0.10.0
libtpu: 0.0.40
codegen_flags: <defaults>
</compile_context>

<pallas_src>
import numpy as np
import jax
import jax.numpy as jnp
from jax.experimental import pallas as pl
from jax.experimental.pallas import tpu as pltpu

# ----------------------- MelSpectrogram config (synthetic, small) -------------
SR = 16000
N_FFT = 64
WIN_LENGTH = 64
HOP_LENGTH = 16
N_MELS = 8
F_MIN = 0.0
F_MAX = SR / 2.0
N_FREQS = N_FFT // 2 + 1          # onesided rfft bins = 33
K_PAD = 128                       # 2*N_FREQS = 66 zero-padded to a full 128-lane dim
TM_MAX = 512                      # frames per tile (kernel lane dim); multiple of 128


def _round_up(x, m):
    return ((x + m - 1) // m) * m


# ----------------------- deterministic parameter construction -----------------
def hann_window(win_length):
    # torch.hann_window default: periodic=True
    n = np.arange(win_length, dtype=np.float64)
    return 0.5 * (1.0 - np.cos(2.0 * np.pi * n / win_length))


def melscale_fbanks(n_freqs, f_min, f_max, n_mels, sample_rate):
    # torchaudio defaults: mel_scale="htk", norm=None
    def hz_to_mel(f):
        return 2595.0 * np.log10(1.0 + f / 700.0)

    def mel_to_hz(m):
        return 700.0 * (10.0 ** (m / 2595.0) - 1.0)

    all_freqs = np.linspace(0.0, sample_rate / 2.0, n_freqs)
    m_pts = np.linspace(hz_to_mel(f_min), hz_to_mel(f_max), n_mels + 2)
    f_pts = mel_to_hz(m_pts)
    f_diff = f_pts[1:] - f_pts[:-1]                      # (n_mels + 1,)
    slopes = f_pts[None, :] - all_freqs[:, None]         # (n_freqs, n_mels + 2)
    down = -slopes[:, :-2] / f_diff[:-1]
    up = slopes[:, 2:] / f_diff[1:]
    fb = np.maximum(0.0, np.minimum(down, up))
    return fb.astype(np.float32)                          # (n_freqs, n_mels)


def dft_bases(n_fft, n_freqs):
    n = np.arange(n_fft, dtype=np.float64)[:, None]
    k = np.arange(n_freqs, dtype=np.float64)[None, :]
    ang = 2.0 * np.pi * n * k / n_fft
    return np.cos(ang), np.sin(ang)


def build_constants():
    """Fused, window-folded DFT basis and doubled mel filterbank (transposed)."""
    window = hann_window(WIN_LENGTH)                      # (n_fft,) float64
    cos_b, sin_b = dft_bases(N_FFT, N_FREQS)              # (n_fft, n_freqs)
    fb = melscale_fbanks(N_FREQS, F_MIN, F_MAX, N_MELS, SR)

    # basis[:, :33]  = window * cos,  basis[:, 33:66] = window * sin, rest zero
    basis = np.zeros((N_FFT, K_PAD), dtype=np.float64)
    basis[:, :N_FREQS] = cos_b * window[:, None]
    basis[:, N_FREQS:2 * N_FREQS] = sin_b * window[:, None]

    # fb stacked twice so re^2 and im^2 both hit the same mel weights; pad rows zero
    fb2 = np.zeros((K_PAD, N_MELS), dtype=np.float32)
    fb2[:N_FREQS] = fb
    fb2[N_FREQS:2 * N_FREQS] = fb

    basis_t = jnp.asarray(basis.T.astype(np.float32))     # (K_PAD, N_FFT) = (128, 64)
    fb2_t = jnp.asarray(fb2.T)                            # (N_MELS, K_PAD) = (8, 128)
    return (basis_t, fb2_t,
            window.astype(np.float32),
            cos_b.astype(np.float32), sin_b.astype(np.float32), fb)


# ----------------------- Pallas kernel -----------------------------------------
def mel_kernel(frames_ref, basis_ref, fb_ref, out_ref):
    # frames_ref: (N_FFT, TM)  frames on lanes
    # basis_ref : (K_PAD, N_FFT)  window-folded [cos; sin; 0] basis, transposed
    # fb_ref    : (N_MELS, K_PAD) doubled mel filterbank, transposed
    # out_ref   : (N_MELS, TM)    lane-dense output
    reim = jnp.dot(basis_ref[...], frames_ref[...],
                   preferred_element_type=jnp.float32)        # (K_PAD, TM) re|im|0
    power = reim * reim                                       # |X|^2 pieces (power=2.0)
    mel = jnp.dot(fb_ref[...], power,
                  preferred_element_type=jnp.float32)         # (N_MELS, TM)
    out_ref[...] = jnp.log(mel + 0.001)                       # log(mel + 1e-3)


def mel_rows_pallas(frames_t, basis_t, fb2_t, tm):
    _, rows_padded = frames_t.shape
    assert rows_padded % tm == 0 and tm % 128 == 0
    grid = (rows_padded // tm,)
    return pl.pallas_call(
        mel_kernel,
        out_shape=jax.ShapeDtypeStruct((N_MELS, rows_padded), jnp.float32),
        grid_spec=pltpu.PrefetchScalarGridSpec(
            num_scalar_prefetch=0,
            grid=grid,
            in_specs=[
                pl.BlockSpec((N_FFT, tm), lambda i: (0, i)),
                pl.BlockSpec((K_PAD, N_FFT), lambda i: (0, 0)),
                pl.BlockSpec((N_MELS, K_PAD), lambda i: (0, 0)),
            ],
            out_specs=pl.BlockSpec((N_MELS, tm), lambda i: (0, i)),
        ),
        compiler_params=pltpu.CompilerParams(
            dimension_semantics=("parallel",)      # lets v7x shard tiles across its 2 TCs
        ),
    )(frames_t, basis_t, fb2_t)


# ----------------------- wrapper (glue in plain JAX) ----------------------------
def mel_spectrogram_fixed(x, basis_t, fb2_t):
    """x: (B, T) float32 waveform -> (B, n_mels, n_frames - 1) float32."""
    B, T = x.shape
    pad = N_FFT // 2
    # center=True, pad_mode="reflect" (torchaudio Spectrogram default)
    xp = jnp.pad(x, ((0, 0), (pad, pad)), mode="reflect")
    t_padded = T + 2 * pad
    n_frames = 1 + (t_padded - N_FFT) // HOP_LENGTH

    # frame with frames on the last (lane) axis: (B, n_fft, n_frames)
    idx = (np.arange(N_FFT)[:, None] + np.arange(n_frames)[None, :] * HOP_LENGTH)
    frames_t = xp[:, idx]                                         # (B, n_fft, n_frames)
    # major-axis permutation only (last dim stays in place) -> (n_fft, B*n_frames)
    frames_t = jnp.transpose(frames_t, (1, 0, 2)).reshape(N_FFT, B * n_frames)

    rows = B * n_frames
    tm = min(TM_MAX, _round_up(rows, 128))
    rows_padded = _round_up(rows, tm)
    frames_t = jnp.pad(frames_t, ((0, 0), (0, rows_padded - rows)))

    mel_t = mel_rows_pallas(frames_t.astype(jnp.float32), basis_t, fb2_t, tm)

    mel = mel_t[:, :rows].reshape(N_MELS, B, n_frames)
    mel = jnp.transpose(mel, (1, 0, 2))                           # (B, n_mels, n_frames)
    return mel[..., :-1]                                          # drop last frame


# ----------------------- pure-JAX reference (for sanity check) ------------------
def mel_reference(x, window, cos_b, sin_b, fb):
    B, T = x.shape
    pad = N_FFT // 2
    xp = jnp.pad(x, ((0, 0), (pad, pad)), mode="reflect")
    n_frames = 1 + (T + 2 * pad - N_FFT) // HOP_LENGTH
    idx = (np.arange(n_frames)[:, None] * HOP_LENGTH + np.arange(N_FFT)[None, :])
    frames = xp[:, idx] * window                                  # (B, F, n_fft)
    re = jnp.einsum("bfn,nk->bfk", frames, jnp.asarray(cos_b))
    im = jnp.einsum("bfn,nk->bfk", frames, jnp.asarray(sin_b))
    power = re * re + im * im
    mel = jnp.einsum("bfk,km->bfm", power, jnp.asarray(fb))
    out = jnp.log(mel + 0.001)
    return jnp.transpose(out, (0, 2, 1))[..., :-1]


# ----------------------- main ---------------------------------------------------
if __name__ == "__main__":
    key = jax.random.PRNGKey(0)
    B, T = 2, 256                                          # small synthetic waveform
    x = jax.random.normal(key, (B, T), dtype=jnp.float32)

    basis_t, fb2_t, window, cos_b, sin_b, fb = build_constants()

    out = mel_spectrogram_fixed(x, basis_t, fb2_t)
    out = jax.block_until_ready(out)

    ref = jax.block_until_ready(mel_reference(x, jnp.asarray(window), cos_b, sin_b, fb))
    assert out.shape == (B, N_MELS, T // HOP_LENGTH), out.shape
    np.testing.assert_allclose(np.asarray(out), np.asarray(ref), rtol=2e-3, atol=2e-3)

    print("KERNEL_OK")
</pallas_src>

<mosaic_0001>
module attributes {stable_mosaic.version = 11 : i64} {
  func.func @mel_kernel(%arg0: i32, %arg1: memref<64x128xf32, #tpu.memory_space<vmem>>, %arg2: memref<128x64xf32, #tpu.memory_space<vmem>>, %arg3: memref<8x128xf32, #tpu.memory_space<vmem>>, %arg4: memref<8x128xf32, #tpu.memory_space<vmem>>) attributes {dimension_semantics = [#tpu.dimension_semantics<parallel>], iteration_bounds = array<i64: 1>, scalar_prefetch = 0 : i64, scratch_operands = 0 : i64, tpu.core_type = #tpu.core_type<tc>, window_params = [{transform_indices = @transform_0, window_bounds = array<i64: 64, 128>}, {pipeline_mode = #tpu.pipeline_mode<synchronous>, transform_indices = @transform_1, window_bounds = array<i64: 128, 64>}, {pipeline_mode = #tpu.pipeline_mode<synchronous>, transform_indices = @transform_2, window_bounds = array<i64: 8, 128>}, {transform_indices = @transform_3, window_bounds = array<i64: 8, 128>}]} {
    %c0 = arith.constant 0 : index
    %c0_0 = arith.constant 0 : index
    %0 = vector.load %arg2[%c0, %c0_0] : memref<128x64xf32, #tpu.memory_space<vmem>>, vector<128x64xf32>
    %c0_1 = arith.constant 0 : index
    %c0_2 = arith.constant 0 : index
    %1 = vector.load %arg1[%c0_1, %c0_2] : memref<64x128xf32, #tpu.memory_space<vmem>>, vector<64x128xf32>
    %cst = arith.constant dense<0.000000e+00> : vector<128x128xf32>
    %2 = tpu.matmul %0, %1, %cst {dimension_numbers = #tpu.dot_dimension_numbers<[1], [0], [0], [1], [0, 0, 1, 1], [], []>} : vector<128x64xf32>, vector<64x128xf32>, vector<128x128xf32> -> vector<128x128xf32>
    %3 = arith.mulf %2, %2 : vector<128x128xf32>
    %c0_3 = arith.constant 0 : index
    %c0_4 = arith.constant 0 : index
    %4 = vector.load %arg3[%c0_3, %c0_4] : memref<8x128xf32, #tpu.memory_space<vmem>>, vector<8x128xf32>
    %cst_5 = arith.constant dense<0.000000e+00> : vector<8x128xf32>
    %5 = tpu.matmul %4, %3, %cst_5 {dimension_numbers = #tpu.dot_dimension_numbers<[1], [0], [0], [1], [0, 0, 1, 1], [], []>} : vector<8x128xf32>, vector<128x128xf32>, vector<8x128xf32> -> vector<8x128xf32>
    %cst_6 = arith.constant 1.000000e-03 : f32
    %6 = vector.broadcast %cst_6 : f32 to vector<8x128xf32>
    %7 = arith.addf %5, %6 : vector<8x128xf32>
    %8 = math.log %7 : vector<8x128xf32>
    %c0_7 = arith.constant 0 : index
    %c0_8 = arith.constant 0 : index
    %9 = vector.load %arg4[%c0_7, %c0_8] : memref<8x128xf32, #tpu.memory_space<vmem>>, vector<8x128xf32>
    tpu.vector_store %arg4[%c0_7, %c0_8], %8 {strides = array<i32>} : memref<8x128xf32, #tpu.memory_space<vmem>>, vector<8x128xf32>,
    return
  }
  func.func @transform_0(%arg0: i32) -> (i32, i32) {
    %c0_i32 = arith.constant 0 : i32
    %c0_i32_0 = arith.constant 0 : i32
    return %c0_i32, %arg0 : i32, i32
  }
  func.func @transform_1(%arg0: i32) -> (i32, i32) {
    %c0_i32 = arith.constant 0 : i32
    %c0_i32_0 = arith.constant 0 : i32
    %c0_i32_1 = arith.constant 0 : i32
    return %c0_i32, %c0_i32_0 : i32, i32
  }
  func.func @transform_2(%arg0: i32) -> (i32, i32) {
    %c0_i32 = arith.constant 0 : i32
    %c0_i32_0 = arith.constant 0 : i32
    %c0_i32_1 = arith.constant 0 : i32
    return %c0_i32, %c0_i32_0 : i32, i32
  }
  func.func @transform_3(%arg0: i32) -> (i32, i32) {
    %c0_i32 = arith.constant 0 : i32
    %c0_i32_0 = arith.constant 0 : i32
    return %c0_i32, %arg0 : i32, i32
  }
}

</mosaic_0001>

<bundles_post_ra>
// kernel: tpu_custom_call.1
= control target key start
LH: loop header
LB: loop body
LE: loop exit
PB: predicated region body
PF: predicated region fallthrough
CT: control target
= control target key end

     0   :  { %vm39_vm0 = vcmask 523264   ;;  %s666_s0 = inlined_call_operand.vmem [shape: f32[64,128], index: 0, kind: input, shape index: {}]   ;;  %s667_s1 = inlined_call_operand.vmem [shape: f32[128,64], index: 1, kind: input, shape index: {}]   ;;  %s668_s2 = inlined_call_operand.vmem [shape: f32[8,128], index: 2, kind: input, shape index: {}]   ;;  %s669_s3 = inlined_call_operand.hbm [shape: f32[8,128], index: 3, kind: output, shape index: {}]  }
   0x1   :  { %v31_v0 = vld [vmem:[%s666_s0] sm:$0xff]  ;;  %v32_v1 = vld [vmem:[%s666_s0 + $0x8] sm:$0xff]  ;;  %v33_v2 = vld [vmem:[%s666_s0 + $0x10] sm:$0xff] }
   0x2   :  { %v469_v3 = vpack.c.bf16 %v32_v1, %v31_v0  ;;  %v34_v4 = vld [vmem:[%s666_s0 + $0x18] sm:$0xff]  ;;  %v35_v6 = vld [vmem:[%s666_s0 + $0x20] sm:$0xff]  ;;  %v36_v7 = vld [vmem:[%s666_s0 + $0x28] sm:$0xff] }
   0x3   :  { %v473_v5 = vpack.c.bf16 %v34_v4, %v33_v2  ;;  %v15_v8 = vld [vmem:[%s667_s1] sm:$0xff]  ;;  %v477_v9 = vpack.c.bf16 %v36_v7, %v35_v6  ;;  %v37_v10 = vld [vmem:[%s666_s0 + $0x30] sm:$0xff]  ;;  %v38_v11 = vld [vmem:[%s666_s0 + $0x38] sm:$0xff] }
   0x4   :  { %470 = vmatprep.subr.bf16.mxu0 %v469_v3  ;;  %410 = vmatprep.mubr.msk.f32.mxu0 %vm39_vm0, %v15_v8 }
   0x5   :  { %472 = vmatpush3.bf16.msra.mxu0 %v469_v3 }
   0x6   :  { %474 = vmatprep.subr.bf16.mxu0 %v473_v5 }
   0x9   :  { %476 = vmatpush3.bf16.msra.mxu0 %v473_v5 }
   0xa   :  { %8 = vsyncpa [#allocation3], 0  ;;  %478 = vmatprep.subr.bf16.mxu0 %v477_v9  ;;  %v481_v12 = vpack.c.bf16 %v38_v11, %v37_v10  ;;  %v16_v13 = vld [vmem:[%s667_s1 + $0x8] sm:$0xff]  ;;  %v17_v14 = vld [vmem:[%s667_s1 + $0x10] sm:$0xff]  ;;  %v539_v28 = vmov 0.0|0.0   ;;  %vm540_vm1 = vmmov 0  }
   0xb   :  { %v18_v15 = vld [vmem:[%s667_s1 + $0x18] sm:$0xff]  ;;  %v19_v16 = vld [vmem:[%s667_s1 + $0x20] sm:$0xff]  ;;  %v20_v17 = vld [vmem:[%s667_s1 + $0x28] sm:$0xff]  ;;  %485 = vmatprep.subr.bf16.mxu1 %v539_v28  ;;  %v541_v29 = vmov 0.0   ;;  %s542_s6 = smov [#allocation2]  }
   0xc   :  { %v21_v18 = vld [vmem:[%s667_s1 + $0x30] sm:$0xff]  ;;  %v22_v19 = vld [vmem:[%s667_s1 + $0x38] sm:$0xff]  ;;  %v23_v20 = vld [vmem:[%s667_s1 + $0x40] sm:$0xff]  ;;  %466 = vmatprep.mubr.msk.f32.mxu1 %vm540_vm1, %v541_v29  ;;  %s329_s0 = sshll.u32 %s542_s6, 4  ;;  %s330_s0 = int_to_ptr.vmem [resolvable:$true] %s329_s0 }
   0xd   :  { %480 = vmatpush3.bf16.msra.mxu0 %v477_v9  ;;  %v24_v21 = vld [vmem:[%s667_s1 + $0x48] sm:$0xff]  ;;  %v25_v22 = vld [vmem:[%s667_s1 + $0x50] sm:$0xff]  ;;  %v26_v23 = vld [vmem:[%s667_s1 + $0x58] sm:$0xff]  ;;  %s515_s7 = scalar_lea.vmem %s330_s0, 128  ;;  %p520_p1 = scmp.lt.s32.totalorder %s330_s0, %s330_s0 }
   0xe   :  { %482 = vmatprep.subr.bf16.mxu0 %v481_v12  ;;  %v27_v24 = vld [vmem:[%s667_s1 + $0x60] sm:$0xff]  ;;  %v28_v25 = vld [vmem:[%s667_s1 + $0x68] sm:$0xff]  ;;  %v29_v26 = vld [vmem:[%s667_s1 + $0x70] sm:$0xff]  ;;  %p516_p0 = scmp.ne.s32.totalorder %s330_s0, %s515_s7  ;;  %p521_p2 = scmp.lt.s32.totalorder %s515_s7, %s515_s7 }
   0xf   :  { %v30_v27 = vld [vmem:[%s667_s1 + $0x78] sm:$0xff]  ;;  %v249_v6 = vld [vmem:[%s668_s2] sm:$0xff] }
  0x10   :  { %p522_p3 = por %p521_p2, %p520_p1 }
  0x11   :  { %484 = vmatpush3.bf16.msra.mxu0 %v481_v12 }
  0x12   :  { %p523_p4 = pnand %p522_p3, %p516_p0 }
  0x14   :  { %411 = vmatmul.mubr.msk.f32.vlgmr.msra.gmra.mrb[0].mxu0 %vm39_vm0, %v16_v13 }
  0x15   :  { %413 = vmatprep.mubr.msk.f32.mxu0 %vm39_vm0, %v17_v14 }
  0x18   :  { %414 = vmatmul.mubr.msk.f32.gmra.mrb[2].mxu0 %vm39_vm0, %v18_v15 }
  0x19   :  { %416 = vmatprep.mubr.msk.f32.mxu0 %vm39_vm0, %v19_v16 }
  0x1c   :  { %417 = vmatmul.mubr.msk.f32.gmra.mrb[4].mxu0 %vm39_vm0, %v20_v17 }
  0x1d   :  { %419 = vmatprep.mubr.msk.f32.mxu0 %vm39_vm0, %v21_v18 }
  0x20   :  { %420 = vmatmul.mubr.msk.f32.gmra.mrb[6].mxu0 %vm39_vm0, %v22_v19 }
  0x21   :  { %422 = vmatprep.mubr.msk.f32.mxu0 %vm39_vm0, %v23_v20 }
  0x24   :  { %423 = vmatmul.mubr.msk.f32.gmra.mrb[8].mxu0 %vm39_vm0, %v24_v21 }
  0x25   :  { %425 = vmatprep.mubr.msk.f32.mxu0 %vm39_vm0, %v25_v22 }
  0x28   :  { %426 = vmatmul.mubr.msk.f32.gmra.mrb[10].mxu0 %vm39_vm0, %v26_v23 }
  0x29   :  { %428 = vmatprep.mubr.msk.f32.mxu0 %vm39_vm0, %v27_v24 }
  0x2c   :  { %429 = vmatmul.mubr.msk.f32.gmra.mrb[12].mxu0 %vm39_vm0, %v28_v25 }
  0x2d   :  { %431 = vmatprep.mubr.msk.f32.mxu0 %vm39_vm0, %v29_v26 }
  0x30   :  { %432 = vmatmul.mubr.msk.f32.gmra.mrb[14].mxu0 %vm39_vm0, %v30_v27 }
  0xe7   :  { %v412_v30 = vpop.f32.mrb[0].mxu0 }
  0xe8   :  { %v234_v31 = vmul.f32 %v412_v30, %v412_v30  ;;  %v154_v32 = vpop.f32.mrb[1].mxu0 }
  0xe9   :  { %v233_v33 = vmul.f32 %v154_v32, %v154_v32 }
  0xeb   :  { %v415_v34 = vpop.f32.mrb[2].mxu0  ;;  %v486_v35 = vpack.c.bf16 %v234_v31, %v233_v33 }
  0xec   :  { %v236_v36 = vmul.f32 %v415_v34, %v415_v34  ;;  %v164_v37 = vpop.f32.mrb[3].mxu0 }
  0xed   :  { %v235_v38 = vmul.f32 %v164_v37, %v164_v37  ;;  %487 = vmatpush3.bf16.msra.mxu1 %v486_v35 }
  0xee   :  { %488 = vmatprep.subr.bf16.mxu1 %v539_v28 }
  0xef   :  { %v489_v39 = vpack.c.bf16 %v236_v36, %v235_v38  ;;  %v418_v40 = vpop.f32.mrb[4].mxu0 }
  0xf0   :  { %v238_v41 = vmul.f32 %v418_v40, %v418_v40  ;;  %v174_v42 = vpop.f32.mrb[5].mxu0 }
  0xf1   :  { %v237_v43 = vmul.f32 %v174_v42, %v174_v42  ;;  %490 = vmatpush3.bf16.msra.mxu1 %v489_v39 }
  0xf2   :  { %491 = vmatprep.subr.bf16.mxu1 %v539_v28 }
  0xf3   :  { %v492_v44 = vpack.c.bf16 %v238_v41, %v237_v43  ;;  %v421_v45 = vpop.f32.mrb[6].mxu0 }
  0xf4   :  { %v240_v46 = vmul.f32 %v421_v45, %v421_v45  ;;  %v184_v47 = vpop.f32.mrb[7].mxu0 }
  0xf5   :  { %v239_v48 = vmul.f32 %v184_v47, %v184_v47  ;;  %493 = vmatpush3.bf16.msra.mxu1 %v492_v44 }
  0xf6   :  { %494 = vmatprep.subr.bf16.mxu1 %v539_v28 }
  0xf7   :  { %v495_v49 = vpack.c.bf16 %v240_v46, %v239_v48  ;;  %v424_v50 = vpop.f32.mrb[8].mxu0 }
  0xf8   :  { %v242_v51 = vmul.f32 %v424_v50, %v424_v50  ;;  %v194_v52 = vpop.f32.mrb[9].mxu0 }
  0xf9   :  { %v241_v53 = vmul.f32 %v194_v52, %v194_v52  ;;  %496 = vmatpush3.bf16.msra.mxu1 %v495_v49 }
  0xfa   :  { %497 = vmatprep.subr.bf16.mxu1 %v539_v28 }
  0xfb   :  { %v498_v54 = vpack.c.bf16 %v242_v51, %v241_v53  ;;  %v427_v55 = vpop.f32.mrb[10].mxu0 }
  0xfc   :  { %v244_v56 = vmul.f32 %v427_v55, %v427_v55  ;;  %v204_v57 = vpop.f32.mrb[11].mxu0 }
  0xfd   :  { %v243_v58 = vmul.f32 %v204_v57, %v204_v57  ;;  %499 = vmatpush3.bf16.msra.mxu1 %v498_v54 }
  0xfe   :  { %500 = vmatprep.subr.bf16.mxu1 %v539_v28 }
  0xff   :  { %v501_v59 = vpack.c.bf16 %v244_v56, %v243_v58  ;;  %v430_v60 = vpop.f32.mrb[12].mxu0 }
 0x100   :  { %v246_v61 = vmul.f32 %v430_v60, %v430_v60  ;;  %v214_v62 = vpop.f32.mrb[13].mxu0 }
 0x101   :  { %v245_v63 = vmul.f32 %v214_v62, %v214_v62  ;;  %502 = vmatpush3.bf16.msra.mxu1 %v501_v59 }
 0x102   :  { %503 = vmatprep.subr.bf16.mxu1 %v539_v28 }
 0x103   :  { %v504_v0 = vpack.c.bf16 %v246_v61, %v245_v63  ;;  %v433_v1 = vpop.f32.mrb[14].mxu0 }
 0x104   :  { %v248_v2 = vmul.f32 %v433_v1, %v433_v1  ;;  %v224_v3 = vpop.f32.mrb[15].mxu0 }
 0x105   :  { %v247_v4 = vmul.f32 %v224_v3, %v224_v3  ;;  %505 = vmatpush3.bf16.msra.mxu1 %v504_v0 }
 0x106   :  { %506 = vmatprep.subr.bf16.mxu1 %v539_v28 }
 0x107   :  { %v507_v5 = vpack.c.bf16 %v248_v2, %v247_v4 }
 0x109   :  { %508 = vmatpush3.bf16.msra.mxu1 %v507_v5 }
 0x10c   :  { %467 = vmatmul.mubr.f32.vlgmr.msra.gmra.mrb[0].mxu1 %v249_v6 }
 0x1df   :  { %v316_v7 = vpop.f32.mrb[0].mxu1 }
 0x1e0   :  { %v317_v8 = vadd.f32 0.001, %v316_v7  ;;  %v468_v9 = vpop.f32.mrb[1].mxu1 }
 0x1e2   :  { %513 = vlog2.f32 %v317_v8 }
 0x1ec   :  { %v514_v10 = vpop.eup %513 }
 0x1ed   :  { %v321_v11 = vmul.f32 0.6931472, %v514_v10 }
 0x1ef   :  { %322 = vst [vmem:[#allocation2] sm:$0xff] %v321_v11 }
 0x1f0   :  { %526 = shalt.err (!%p523_p4)
}
 0x1f1   :  { %s527_s9 = scalar_lea.hbm %s669_s3, 128 }
 0x1f2   :  { %p528_p5 = scmp.ne.s32.totalorder %s669_s3, %s527_s9  ;;  %p531_p6 = scmp.lt.u32.totalorder %s527_s9, %s669_s3 }
 0x1f4   :  { %p533_p7 = pnand %p531_p6, %p528_p5 }
 0x1f6   :  { %536 = shalt.err (!%p533_p7)
}
 0x1f7   :  { %332 = dma.vmem_to_hbm [thread:$0]  %s330_s0, 128, %s669_s3, [#allocation3]  }
 0x1f8   :  { %537 = dma.done.wait [#allocation3], 128  }
 0x1f9   :  { %538 = vsyncadd [#allocation3], 4294967168 }
 0x1fa   :  { %336 = vsyncpa [#allocation3], 1 }

</bundles_post_ra>
